<compile_context>
chip_gen: v5e
topology: v5e:2x2
jax: 0.10.0
libtpu: 0.0.40
codegen_flags: <defaults>
</compile_context>

<pallas_src>
import jax
import jax.numpy as jnp
from jax.experimental import pallas as pl
from jax.experimental.pallas import tpu as pltpu


def _round_up(x, m):
    return ((x + m - 1) // m) * m


def _make_fused_mlp_kernel(n_hidden):
    """Kernel refs: x, then (w, scale, shift) per hidden layer, then (w, b), then out."""

    def kernel(*refs):
        x_ref = refs[0]
        o_ref = refs[-1]
        p = refs[1:-1]

        h = x_ref[...]                                   # bf16 activation tile (bm, K)
        idx = 0
        for _ in range(n_hidden):
            w_ref, scale_ref, shift_ref = p[idx], p[idx + 1], p[idx + 2]
            idx += 3
            acc = jnp.dot(h, w_ref[...], preferred_element_type=jnp.float32)
            acc = acc * scale_ref[...] + shift_ref[...]  # Linear bias + BatchNorm (eval) folded
            acc = jnp.maximum(acc, 0.0)                  # ReLU; Dropout is identity in eval
            h = acc.astype(jnp.bfloat16)                 # stays in VMEM / vregs, never hits HBM
        w_ref, b_ref = p[idx], p[idx + 1]
        acc = jnp.dot(h, w_ref[...], preferred_element_type=jnp.float32)
        acc = acc + b_ref[...]
        o_ref[...] = acc.astype(o_ref.dtype)

    return kernel


def init_mlp_params(key, input_size, hidden_sizes, output_size, eps=1e-5):
    """Synthetic parameters matching the PyTorch module's shapes, pre-folded and
    zero-padded to lane-dense (multiple-of-128) feature widths."""
    in_pad = _round_up(input_size, 128)
    layers = []
    in_dim, in_dim_pad = input_size, in_pad
    for h in hidden_sizes:
        h_pad = _round_up(h, 128)
        key, kw, kb, kg, kbeta, km, kv = jax.random.split(key, 7)
        bound = 1.0 / jnp.sqrt(in_dim)
        w = jax.random.uniform(kw, (in_dim, h), jnp.float32, -bound, bound)
        b = jax.random.uniform(kb, (1, h), jnp.float32, -bound, bound)
        gamma = 1.0 + 0.1 * jax.random.normal(kg, (1, h), jnp.float32)
        beta = 0.1 * jax.random.normal(kbeta, (1, h), jnp.float32)
        mean = 0.1 * jax.random.normal(km, (1, h), jnp.float32)
        var = jnp.abs(1.0 + 0.1 * jax.random.normal(kv, (1, h), jnp.float32))
        scale = gamma / jnp.sqrt(var + eps)
        # Fold Linear bias into BN shift: scale*(x@W + b - mean) + beta
        shift = beta + scale * (b - mean)
        # Zero-pad to lane-dense widths (padded cols produce 0 after scale*0+shift(=0), ReLU keeps 0,
        # and the next layer's padded weight rows are zero, so padding never leaks).
        w_p = jnp.zeros((in_dim_pad, h_pad), jnp.float32).at[:in_dim, :h].set(w)
        scale_p = jnp.zeros((1, h_pad), jnp.float32).at[:, :h].set(scale)
        shift_p = jnp.zeros((1, h_pad), jnp.float32).at[:, :h].set(shift)
        layers.append(dict(kind="hidden", w=w_p.astype(jnp.bfloat16),
                           scale=scale_p, shift=shift_p))
        in_dim, in_dim_pad = h, h_pad

    out_pad = _round_up(output_size, 128)
    key, kw, kb = jax.random.split(key, 3)
    bound = 1.0 / jnp.sqrt(in_dim)
    w = jax.random.uniform(kw, (in_dim, output_size), jnp.float32, -bound, bound)
    b = jax.random.uniform(kb, (1, output_size), jnp.float32, -bound, bound)
    w_p = jnp.zeros((in_dim_pad, out_pad), jnp.float32).at[:in_dim, :output_size].set(w)
    b_p = jnp.zeros((1, out_pad), jnp.float32).at[:, :output_size].set(b)
    layers.append(dict(kind="final", w=w_p.astype(jnp.bfloat16), b=b_p))

    return dict(layers=layers, input_size=input_size, in_pad=in_pad,
                output_size=output_size, out_pad=out_pad, n_hidden=len(hidden_sizes))


def mlp_forward(x, params, *, bm=None):
    """x: (B, input_size) float. Returns (B, output_size) float32."""
    B = x.shape[0]
    in_pad, out_pad = params["in_pad"], params["out_pad"]
    n_hidden = params["n_hidden"]

    if bm is None:
        bm = min(128, _round_up(B, 8))     # fill sublanes / MXU rows when batch permits
    B_pad = _round_up(B, bm)

    xp = jnp.zeros((B_pad, in_pad), jnp.bfloat16)
    xp = xp.at[:B, :x.shape[1]].set(x.astype(jnp.bfloat16))

    args = []
    in_specs = [pl.BlockSpec((bm, in_pad), lambda i: (i, 0))]   # batch row tile
    flops = 0
    bytes_accessed = xp.size * xp.dtype.itemsize + B_pad * out_pad * 4

    def _full_spec(shape):
        # Whole parameter resident in VMEM for every grid step (a few hundred KiB total).
        return pl.BlockSpec(shape, lambda i: (0, 0))

    for layer in params["layers"]:
        w = layer["w"]
        flops += 2 * B_pad * w.shape[0] * w.shape[1]
        arrs = ((w, layer["scale"], layer["shift"]) if layer["kind"] == "hidden"
                else (w, layer["b"]))
        for arr in arrs:
            args.append(arr)
            in_specs.append(_full_spec(arr.shape))
            bytes_accessed += arr.size * arr.dtype.itemsize

    out = pl.pallas_call(
        _make_fused_mlp_kernel(n_hidden),
        out_shape=jax.ShapeDtypeStruct((B_pad, out_pad), jnp.float32),
        grid=(B_pad // bm,),
        in_specs=in_specs,
        out_specs=pl.BlockSpec((bm, out_pad), lambda i: (i, 0)),
        compiler_params=pltpu.CompilerParams(
            dimension_semantics=("parallel",)),      # v7x: shard batch tiles across 2 TCs
        cost_estimate=pl.CostEstimate(flops=int(flops), transcendentals=0,
                                      bytes_accessed=int(bytes_accessed)),
    )(xp, *args)
    return out[:B, :params["output_size"]]


def mlp_reference(x, params):
    """Pure-JAX reference (same bf16 inputs / f32 accumulation as the kernel)."""
    xp = jnp.zeros((x.shape[0], params["in_pad"]), jnp.float32).at[:, :x.shape[1]].set(x)
    h = xp.astype(jnp.bfloat16).astype(jnp.float32)
    for layer in params["layers"]:
        w = layer["w"].astype(jnp.float32)
        if layer["kind"] == "hidden":
            h = jnp.maximum(h @ w * layer["scale"] + layer["shift"], 0.0)
            h = h.astype(jnp.bfloat16).astype(jnp.float32)
        else:
            h = h @ w + layer["b"]
    return h[:, :params["output_size"]]


if __name__ == "__main__":
    batch = 256
    input_size = 256           # e.g. morgan fingerprint length (small synthetic)
    hidden_sizes = [128, 64]
    output_size = 16

    key = jax.random.PRNGKey(0)
    key, kx = jax.random.split(key)
    # data.morgan_fp : binary fingerprint vector, shape (batch, input_size)
    x = (jax.random.uniform(kx, (batch, input_size)) > 0.5).astype(jnp.float32)

    params = init_mlp_params(key, input_size, hidden_sizes, output_size)

    out = mlp_forward(x, params)
    out = jax.block_until_ready(out)

    ref = mlp_reference(x, params)
    assert out.shape == (batch, output_size)
    assert jnp.allclose(out, ref, atol=2e-2, rtol=2e-2), "mismatch vs reference"

    print("KERNEL_OK")
</pallas_src>

<mosaic_0001>
module attributes {stable_mosaic.version = 11 : i64} {
  func.func @kernel(%arg0: i32, %arg1: memref<128x256xbf16, #tpu.memory_space<vmem>>, %arg2: memref<256x128xbf16, #tpu.memory_space<vmem>>, %arg3: memref<1x128xf32, #tpu.memory_space<vmem>>, %arg4: memref<1x128xf32, #tpu.memory_space<vmem>>, %arg5: memref<128x128xbf16, #tpu.memory_space<vmem>>, %arg6: memref<1x128xf32, #tpu.memory_space<vmem>>, %arg7: memref<1x128xf32, #tpu.memory_space<vmem>>, %arg8: memref<128x128xbf16, #tpu.memory_space<vmem>>, %arg9: memref<1x128xf32, #tpu.memory_space<vmem>>, %arg10: memref<128x128xf32, #tpu.memory_space<vmem>>) attributes {dimension_semantics = [#tpu.dimension_semantics<parallel>], iteration_bounds = array<i64: 2>, scalar_prefetch = 0 : i64, scratch_operands = 0 : i64, tpu.core_type = #tpu.core_type<tc>, window_params = [{transform_indices = @transform_0, window_bounds = array<i64: 128, 256>}, {pipeline_mode = #tpu.pipeline_mode<synchronous>, transform_indices = @transform_1, window_bounds = array<i64: 256, 128>}, {pipeline_mode = #tpu.pipeline_mode<synchronous>, transform_indices = @transform_2, window_bounds = array<i64: 1, 128>}, {pipeline_mode = #tpu.pipeline_mode<synchronous>, transform_indices = @transform_3, window_bounds = array<i64: 1, 128>}, {pipeline_mode = #tpu.pipeline_mode<synchronous>, transform_indices = @transform_4, window_bounds = array<i64: 128, 128>}, {pipeline_mode = #tpu.pipeline_mode<synchronous>, transform_indices = @transform_5, window_bounds = array<i64: 1, 128>}, {pipeline_mode = #tpu.pipeline_mode<synchronous>, transform_indices = @transform_6, window_bounds = array<i64: 1, 128>}, {pipeline_mode = #tpu.pipeline_mode<synchronous>, transform_indices = @transform_7, window_bounds = array<i64: 128, 128>}, {pipeline_mode = #tpu.pipeline_mode<synchronous>, transform_indices = @transform_8, window_bounds = array<i64: 1, 128>}, {transform_indices = @transform_9, window_bounds = array<i64: 128, 128>}]} {
    %c0 = arith.constant 0 : index
    %c0_0 = arith.constant 0 : index
    %0 = vector.load %arg1[%c0, %c0_0] : memref<128x256xbf16, #tpu.memory_space<vmem>>, vector<128x256xbf16>
    %c0_1 = arith.constant 0 : index
    %c0_2 = arith.constant 0 : index
    %1 = vector.load %arg2[%c0_1, %c0_2] : memref<256x128xbf16, #tpu.memory_space<vmem>>, vector<256x128xbf16>
    %cst = arith.constant dense<0.000000e+00> : vector<128x128xf32>
    %2 = tpu.matmul %0, %1, %cst {dimension_numbers = #tpu.dot_dimension_numbers<[1], [0], [0], [1], [0, 0, 1, 1], [], []>} : vector<128x256xbf16>, vector<256x128xbf16>, vector<128x128xf32> -> vector<128x128xf32>
    %c0_3 = arith.constant 0 : index
    %c0_4 = arith.constant 0 : index
    %3 = vector.load %arg3[%c0_3, %c0_4] : memref<1x128xf32, #tpu.memory_space<vmem>>, vector<1x128xf32>
    %4 = vector.broadcast %3 : vector<1x128xf32> to vector<128x128xf32>
    %5 = arith.mulf %2, %4 : vector<128x128xf32>
    %c0_5 = arith.constant 0 : index
    %c0_6 = arith.constant 0 : index
    %6 = vector.load %arg4[%c0_5, %c0_6] : memref<1x128xf32, #tpu.memory_space<vmem>>, vector<1x128xf32>
    %7 = vector.broadcast %6 : vector<1x128xf32> to vector<128x128xf32>
    %8 = arith.addf %5, %7 : vector<128x128xf32>
    %cst_7 = arith.constant 0.000000e+00 : f32
    %9 = vector.broadcast %cst_7 : f32 to vector<128x128xf32>
    %10 = arith.maximumf %8, %9 : vector<128x128xf32>
    %11 = arith.truncf %10 : vector<128x128xf32> to vector<128x128xbf16>
    %c0_8 = arith.constant 0 : index
    %c0_9 = arith.constant 0 : index
    %12 = vector.load %arg5[%c0_8, %c0_9] : memref<128x128xbf16, #tpu.memory_space<vmem>>, vector<128x128xbf16>
    %cst_10 = arith.constant dense<0.000000e+00> : vector<128x128xf32>
    %13 = tpu.matmul %11, %12, %cst_10 {dimension_numbers = #tpu.dot_dimension_numbers<[1], [0], [0], [1], [0, 0, 1, 1], [], []>} : vector<128x128xbf16>, vector<128x128xbf16>, vector<128x128xf32> -> vector<128x128xf32>
    %c0_11 = arith.constant 0 : index
    %c0_12 = arith.constant 0 : index
    %14 = vector.load %arg6[%c0_11, %c0_12] : memref<1x128xf32, #tpu.memory_space<vmem>>, vector<1x128xf32>
    %15 = vector.broadcast %14 : vector<1x128xf32> to vector<128x128xf32>
    %16 = arith.mulf %13, %15 : vector<128x128xf32>
    %c0_13 = arith.constant 0 : index
    %c0_14 = arith.constant 0 : index
    %17 = vector.load %arg7[%c0_13, %c0_14] : memref<1x128xf32, #tpu.memory_space<vmem>>, vector<1x128xf32>
    %18 = vector.broadcast %17 : vector<1x128xf32> to vector<128x128xf32>
    %19 = arith.addf %16, %18 : vector<128x128xf32>
    %cst_15 = arith.constant 0.000000e+00 : f32
    %20 = vector.broadcast %cst_15 : f32 to vector<128x128xf32>
    %21 = arith.maximumf %19, %20 : vector<128x128xf32>
    %22 = arith.truncf %21 : vector<128x128xf32> to vector<128x128xbf16>
    %c0_16 = arith.constant 0 : index
    %c0_17 = arith.constant 0 : index
    %23 = vector.load %arg8[%c0_16, %c0_17] : memref<128x128xbf16, #tpu.memory_space<vmem>>, vector<128x128xbf16>
    %cst_18 = arith.constant dense<0.000000e+00> : vector<128x128xf32>
    %24 = tpu.matmul %22, %23, %cst_18 {dimension_numbers = #tpu.dot_dimension_numbers<[1], [0], [0], [1], [0, 0, 1, 1], [], []>} : vector<128x128xbf16>, vector<128x128xbf16>, vector<128x128xf32> -> vector<128x128xf32>
    %c0_19 = arith.constant 0 : index
    %c0_20 = arith.constant 0 : index
    %25 = vector.load %arg9[%c0_19, %c0_20] : memref<1x128xf32, #tpu.memory_space<vmem>>, vector<1x128xf32>
    %26 = vector.broadcast %25 : vector<1x128xf32> to vector<128x128xf32>
    %27 = arith.addf %24, %26 : vector<128x128xf32>
    %c0_21 = arith.constant 0 : index
    %c0_22 = arith.constant 0 : index
    %28 = vector.load %arg10[%c0_21, %c0_22] : memref<128x128xf32, #tpu.memory_space<vmem>>, vector<128x128xf32>
    tpu.vector_store %arg10[%c0_21, %c0_22], %27 {strides = array<i32>} : memref<128x128xf32, #tpu.memory_space<vmem>>, vector<128x128xf32>,
    return
  }
  func.func @transform_0(%arg0: i32) -> (i32, i32) {
    %c0_i32 = arith.constant 0 : i32
    %c0_i32_0 = arith.constant 0 : i32
    return %arg0, %c0_i32 : i32, i32
  }
  func.func @transform_1(%arg0: i32) -> (i32, i32) {
    %c0_i32 = arith.constant 0 : i32
    %c0_i32_0 = arith.constant 0 : i32
    %c0_i32_1 = arith.constant 0 : i32
    return %c0_i32, %c0_i32_0 : i32, i32
  }
  func.func @transform_2(%arg0: i32) -> (i32, i32) {
    %c0_i32 = arith.constant 0 : i32
    %c0_i32_0 = arith.constant 0 : i32
    %c0_i32_1 = arith.constant 0 : i32
    return %c0_i32, %c0_i32_0 : i32, i32
  }
  func.func @transform_3(%arg0: i32) -> (i32, i32) {
    %c0_i32 = arith.constant 0 : i32
    %c0_i32_0 = arith.constant 0 : i32
    %c0_i32_1 = arith.constant 0 : i32
    return %c0_i32, %c0_i32_0 : i32, i32
  }
  func.func @transform_4(%arg0: i32) -> (i32, i32) {
    %c0_i32 = arith.constant 0 : i32
    %c0_i32_0 = arith.constant 0 : i32
    %c0_i32_1 = arith.constant 0 : i32
    return %c0_i32, %c0_i32_0 : i32, i32
  }
  func.func @transform_5(%arg0: i32) -> (i32, i32) {
    %c0_i32 = arith.constant 0 : i32
    %c0_i32_0 = arith.constant 0 : i32
    %c0_i32_1 = arith.constant 0 : i32
    return %c0_i32, %c0_i32_0 : i32, i32
  }
  func.func @transform_6(%arg0: i32) -> (i32, i32) {
    %c0_i32 = arith.constant 0 : i32
    %c0_i32_0 = arith.constant 0 : i32
    %c0_i32_1 = arith.constant 0 : i32
    return %c0_i32, %c0_i32_0 : i32, i32
  }
  func.func @transform_7(%arg0: i32) -> (i32, i32) {
    %c0_i32 = arith.constant 0 : i32
    %c0_i32_0 = arith.constant 0 : i32
    %c0_i32_1 = arith.constant 0 : i32
    return %c0_i32, %c0_i32_0 : i32, i32
  }
  func.func @transform_8(%arg0: i32) -> (i32, i32) {
    %c0_i32 = arith.constant 0 : i32
    %c0_i32_0 = arith.constant 0 : i32
    %c0_i32_1 = arith.constant 0 : i32
    return %c0_i32, %c0_i32_0 : i32, i32
  }
  func.func @transform_9(%arg0: i32) -> (i32, i32) {
    %c0_i32 = arith.constant 0 : i32
    %c0_i32_0 = arith.constant 0 : i32
    return %arg0, %c0_i32 : i32, i32
  }
}

</mosaic_0001>

<bundles_post_ra>
// kernel: tpu_custom_call.1
= control target key start
LH: loop header
LB: loop body
LE: loop exit
PB: predicated region body
PF: predicated region fallthrough
CT: control target
= control target key end

     0   :  { %s2131_s0 = inlined_call_operand.hbm [shape: bf16[256,256], index: 0, kind: input, shape index: {}]   ;;  %s2132_s1 = inlined_call_operand.hbm [shape: bf16[256,128], index: 1, kind: input, shape index: {}]   ;;  %s2133_s2 = inlined_call_operand.vmem [shape: f32[1,128], index: 2, kind: input, shape index: {}]   ;;  %s2134_s3 = inlined_call_operand.vmem [shape: f32[1,128], index: 3, kind: input, shape index: {}]   ;;  %s2135_s4 = inlined_call_operand.hbm [shape: bf16[128,128], index: 4, kind: input, shape index: {}]   ;;  %s2136_s5 = inlined_call_operand.vmem [shape: f32[1,128], index: 5, kind: input, shape index: {}]   ;;  %s2137_s6 = inlined_call_operand.vmem [shape: f32[1,128], index: 6, kind: input, shape index: {}]   ;;  %s2138_s7 = inlined_call_operand.hbm [shape: bf16[128,128], index: 7, kind: input, shape index: {}]   ;;  %s2139_s8 = inlined_call_operand.vmem [shape: f32[1,128], index: 8, kind: input, shape index: {}]   ;;  %s2140_s9 = inlined_call_operand.hbm [shape: f32[256,128], index: 9, kind: output, shape index: {}]  }
   0x1   :  { %2141 = sst [smem:[#allocation15_spill]] %s2132_s1 }
   0x2   :  { %2142 = sst [smem:[#allocation16_spill]] %s2135_s4 }
   0x3   :  { %2143 = sst [smem:[#allocation17_spill]] %s2138_s7 }
   0x4   :  { %14 = vsyncpa [#allocation3], 0 }
   0x5   :  { %16 = vsyncpa [#allocation3 + $0x1], 0 }
   0x6   :  { %17 = vsyncpa [#allocation6], 0 }
   0x7   :  { %18 = vsyncpa [#allocation9], 0 }
   0x8   :  { %19 = vsyncpa [#allocation4], 0 }
   0x9   :  { %21 = vsyncpa [#allocation4 + $0x1], 0  ;;  %s1827_s30 = smov 0   ;;  %s1829_s10 = smov 0  }
   0xa   :  { %s1831_s11 = smov 0   ;;  %s1833_s12 = smov 0  }
   0xb LB: > { %s1848_s13 = sadd.s32 4294967295, %s1766_s12   ;;  %s1220_s14 = sadd.s32 4294967294, %s1766_s12   ;;  %s1766_s12 = sphi %s1833_s12, %s2157_s12   ;;  %s1762_s11 = sphi %s1831_s11, %s2156_s11   ;;  %s1758_s10 = sphi %s1829_s10, %s2155_s10   ;;  %s1754_s30 = sphi %s1827_s30, %s2154_s30  }
   0xc   : > { %p47_p0 = scmp.ne.s32.totalorder %s1758_s10, %s1754_s30  ;;  %p48_p1 = scmp.eq.s32.totalorder %s1848_s13, 0 }
   0xd   : > { %p239_p2 = scmp.eq.s32.totalorder %s1848_s13, 1  ;;  %p245_p3 = scmp.eq.s32.totalorder %s1220_s14, 1 }
   0xe   : > { %p1857_p4 = por %p48_p1, %p47_p0  ;;  %p1221_p5 = scmp.ge.s32.totalorder %s1766_s12, 1 }
   0xf   : > { %p1862_p6 = por %p245_p3, %p47_p0  ;;  %p252_p7 = scmp.lt.s32.totalorder %s1766_s12, 3 }
  0x10   : > { %s2146_s1 = sld [smem:[#allocation15_spill]]  ;;  %s1768_s21 = smov [#allocation5]  }
  0x11   : > { %p1870_p8 = pnand %p1221_p5, %p252_p7  ;;  %s265_s22 = sshll.u32 %s1768_s21, 4  ;;  %s266_s22 = int_to_ptr.vmem [resolvable:$true] %s265_s22 }
  0x12   : > { %s2149_s4 = sld [smem:[#allocation16_spill]]  ;;  %s1769_s27 = smov 64  }
  0x13   : > { %p1500_p9 = pneg %p1870_p8  ;;  %s1770_s28 = smov 4  }
  0x14   : > { %s1771_s29 = smov [#allocation7]   ;;  %s2150_s7 = sld [smem:[#allocation17_spill]] }
  0x15   : > { %p1878_p10 = pnand %p1500_p9, %p48_p1  ;;  %s285_s14 = sshll.u32 %s1771_s29, 4  ;;  %s286_s14 = int_to_ptr.vmem [resolvable:$true] %s285_s14 }
  0x16   : > { %s263_s19 = sshll.u32 %s2146_s1, 4  ;;  %s1772_s24 = smov [#allocation8]   ;;  %s264_s19 = int_to_ptr.hbm [resolvable:$true] %s263_s19 }
  0x17   : > { %1503 = dma.hbm_to_vmem [thread:$0]  (!%p1878_p10), %s264_s19, 2048, %s266_s22, [#allocation6], %s1769_s27, %s1769_s27, %s1770_s28  }
  0x18   : > { %s283_s26 = sshll.u32 %s2149_s4, 4  ;;  %s305_s25 = sshll.u32 %s1772_s24, 4  ;;  %s284_s26 = int_to_ptr.hbm [resolvable:$true] %s283_s26  ;;  %s306_s25 = int_to_ptr.vmem [resolvable:$true] %s305_s25 }
  0x19   : > { %1506 = dma.hbm_to_vmem [thread:$0]  (!%p1878_p10), %s284_s26, 1024, %s286_s14, [#allocation6], %s1769_s27, %s1769_s27, %s1770_s28  }
  0x1a   : > { %s303_s21 = sshll.u32 %s2150_s7, 4  ;;  %s1894_s19 = sadd.s32 1, %s1766_s12   ;;  %s304_s21 = int_to_ptr.hbm [resolvable:$true] %s303_s21 }
  0x1b   : > { %1509 = dma.hbm_to_vmem [thread:$0]  (!%p1878_p10), %s304_s21, 1024, %s306_s25, [#allocation9], %s1769_s27, %s1769_s27, %s1770_s28  }
  0x1c   : > { %s31_s22 = ssub.s32 %s1766_s12, %s1894_s19  ;;  %s34_s29 = sadd.s32 1, %s1762_s11 }
  0x1d   : > { %p32_p12 = scmp.eq.s32.totalorder %s31_s22, 0  ;;  %p41_p13 = scmp.ne.s32.totalorder %s1762_s11, %s1758_s10 }
  0x1e   : > { %p42_p0 = scmp.eq.s32.totalorder %s1766_s12, 0  ;;  %p1521_p3 = scmp.lt.s32.totalorder %s1766_s12, 2 }
  0x1f   : > { %s1906_s17 = scalar_select %p32_p12, %s1762_s11, %s34_s29  }
  0x20   : > { %p43_p5 = por %p42_p0, %p41_p13  ;;  %p1910_p7 = por %p239_p2, %p41_p13 }
  0x21   : > { %s322_s14 = sand.u32 1, %s1762_s11   ;;  %s1434_s18 = sshll.u32 %s1766_s12, 7 }
  0x22   : > { %s1226_s23 = sshll.u32 %s322_s14, 7  ;;  %s332_s28 = scalar_lea.hbm %s2131_s0, %s1434_s18 }
  0x23   : > { %s333_s21 = sshll.u32 %s332_s28, 4  ;;  %s326_s25 = scalar_lea.vmem [#allocation2], %s1226_s23  ;;  %s334_s21 = int_to_ptr.hbm [resolvable:$true] %s333_s21 }
  0x24   : > { %s335_s22 = sshll.u32 %s326_s25, 4  ;;  %p1921_p9 = pnand %p1521_p3, %p43_p5  ;;  %s336_s22 = int_to_ptr.vmem [resolvable:$true] %s335_s22 }
  0x25   : > { %s323_s1 = scalar_lea.sflag [#allocation3], %s322_s14  ;;  %s1662_s4 = sshra.s32 %s334_s21, 4  ;;  %s1663_s4 = int_to_ptr.hbm [resolvable:$true] %s1662_s4 }
  0x26   : > { %s1664_s7 = scalar_lea.hbm %s1663_s4, 128  ;;  %p1666_p10 = pneg %p1921_p9 }
  0x27   : > { %p1665_p2 = scmp.ne.s32.totalorder %s1663_s4, %s1664_s7  ;;  %s1669_s24 = scalar_lea.hbm %s2131_s0, 256 }
  0x28   : > { %p1670_p0 = scmp.lt.s32.totalorder %s1663_s4, %s2131_s0  ;;  %p1671_p3 = scmp.lt.s32.totalorder %s1669_s24, %s1664_s7 }
  0x29   : > { %p1667_p12 = pnand %p1666_p10, %p1665_p2 }
  0x2a   : > { %p1672_p5 = por %p1671_p3, %p1670_p0 }
  0x2b   : > { %p1668_p13 = pneg %p1667_p12 }
  0x2d   : > { %p1673_p11 = pnand %p1672_p5, %p1668_p13 }
  0x2f   : > { %1676 = shalt.err (!%p1673_p11)
}
  0x30   : > { %s1773_s14 = smov 128   ;;  %s1774_s25 = smov 8  }
  0x31   : > { %1513 = dma.hbm_to_vmem [thread:$0]  (!%p1921_p9), %s334_s21, 2048, %s336_s22, %s323_s1, %s1773_s14, %s1773_s14, %s1774_s25  }
  0x32   : > { %347 = sbr.rel (%p1870_p8) target bundleno = 643 (0x283), region = 56  ;;  %s1938_s18 = sand.u32 (!%p1870_p8), 1, %s1758_s10  }
  0x33   : > { %s1231_s4 = sshll.u32 (!%p1870_p8), %s1938_s18, 7  ;;  %s350_s7 = scalar_lea.sflag (!%p1870_p8), [#allocation3], %s1938_s18 }
  0x34   : > { %s1944_s23 = scalar_lea.vmem (!%p1870_p8), [#allocation2], %s1231_s4 }
  0x37   : > { %1737 = dma.done.wait (%p1857_p4), %s350_s7, 2048  }
  0x38   : > { %1739 = vsyncadd (%p1857_p4), %s350_s7, 4294965248 }
  0x39   : > { %1741 = dma.done.wait (%p48_p1), [#allocation6], 3072  }
  0x3a   : > { %1743 = vsyncadd (%p48_p1), [#allocation6], 4294964224 }
  0x3b   : > { %1745 = dma.done.wait (%p48_p1), [#allocation9], 1024  }
  0x3c   : > { %1747 = vsyncadd (%p48_p1), [#allocation9], 4294966272  ;;  %v1458_v0 = vld [vmem:[#allocation5 + $0x38] sm:$0xff]  ;;  %v1457_v2 = vld [vmem:[#allocation5 + $0x30] sm:$0xff]  ;;  %s2079_s25 = scalar_lea.vmem [#allocation10], %s1231_s4  ;;  %s1483_s4 = sshll.u32 %s1848_s13, 7 }
  0x3d   : > { %v1466_v1 = vld [vmem:[#allocation5 + $0x78] sm:$0xff]  ;;  %630 = vmatpush.bf16.msra.mxu0 %v1458_v0  ;;  %v1465_v3 = vld [vmem:[#allocation5 + $0x70] sm:$0xff]  ;;  %v1456_v4 = vld [vmem:[#allocation5 + $0x28] sm:$0xff]  ;;  %s1114_s1 = scalar_lea.hbm %s2140_s9, %s1483_s4  ;;  %s1115_s15 = sshll.u32 %s2079_s25, 4  ;;  %s1116_s15 = int_to_ptr.vmem [resolvable:$true] %s1115_s15 }
  0x3e   : > { %679 = vmatpush.bf16.msra.mxu1 %v1466_v1  ;;  %v1464_v5 = vld [vmem:[#allocation5 + $0x68] sm:$0xff]  ;;  %v1455_v6 = vld [vmem:[#allocation5 + $0x20] sm:$0xff]  ;;  %v1454_v8 = vld [vmem:[#allocation5 + $0x18] sm:$0xff]  ;;  %s1117_s20 = sshll.u32 %s1114_s1, 4  ;;  %s1103_s21 = scalar_lea.sflag [#allocation4], %s1938_s18  ;;  %s1118_s20 = int_to_ptr.hbm [resolvable:$true] %s1117_s20 }
  0x3f   : > { %v1463_v7 = vld [vmem:[#allocation5 + $0x60] sm:$0xff]  ;;  %v1462_v9 = vld [vmem:[#allocation5 + $0x58] sm:$0xff]  ;;  %v1453_v10 = vld [vmem:[#allocation5 + $0x10] sm:$0xff]  ;;  %s1706_s22 = sshra.s32 %s1118_s20, 4  ;;  %s1712_s27 = scalar_lea.hbm %s2140_s9, 256  ;;  %s1707_s22 = int_to_ptr.hbm [resolvable:$true] %s1706_s22 }
  0x40   : > { %v1461_v11 = vld [vmem:[#allocation5 + $0x50] sm:$0xff]  ;;  %v1452_v12 = vld [vmem:[#allocation5 + $0x8] sm:$0xff]  ;;  %v1451_v14 = vld [vmem:[#allocation5] sm:$0xff]  ;;  %s1708_s29 = scalar_lea.hbm %s1707_s22, 128  ;;  %p1713_p11 = scmp.lt.s32.totalorder %s1707_s22, %s2140_s9 }
  0x41   : > { %631 = vmatpush.bf16.msra.mxu0 %v1457_v2  ;;  %v1460_v13 = vld [vmem:[#allocation5 + $0x48] sm:$0xff]  ;;  %v1459_v15 = vld [vmem:[#allocation5 + $0x40] sm:$0xff]  ;;  %v1246_v22 = vld [vmem:[%s1944_s23 + $0x10] sm:$0xf]  ;;  %p1709_p1 = scmp.ne.s32.totalorder %s1707_s22, %s1708_s29  ;;  %p1714_p9 = scmp.lt.s32.totalorder %s1712_s27, %s1708_s29 }
  0x42   : > { %680 = vmatpush.bf16.msra.mxu1 %v1465_v3  ;;  %v1238_v16 = vld [vmem:[%s1944_s23] sm:$0xf]  ;;  %v1436_v17 = vld [vmem:[%s1944_s23 + $0x4] sm:$0xf0]  ;;  %v1435_v18 = vld [vmem:[%s1944_s23 + $0x4] sm:$0xf] }
  0x43   : > { %v1240_v19 = vld [vmem:[%s1944_s23 + $0x8] sm:$0xf0]  ;;  %v1239_v20 = vor.u32 %v1436_v17, %v1238_v16  ;;  %v1438_v23 = vld [vmem:[%s1944_s23 + $0x14] sm:$0xf0]  ;;  %v1437_v24 = vld [vmem:[%s1944_s23 + $0x14] sm:$0xf]  ;;  %p1710_p4 = pnand %p1709_p1, %p1910_p7  ;;  %p1715_p2 = por %p1714_p9, %p1713_p11 }
  0x44   : > { %v1243_v21 = vor.u32 %v1435_v18, %v1240_v19  ;;  %v1248_v25 = vld [vmem:[%s1944_s23 + $0x18] sm:$0xf0]  ;;  %v1247_v26 = vor.u32 %v1438_v23, %v1246_v22  ;;  %v1254_v28 = vld [vmem:[%s1944_s23 + $0x20] sm:$0xf]  ;;  %v1440_v29 = vld [vmem:[%s1944_s23 + $0x24] sm:$0xf0] }
  0x45   : > { %632 = vmatpush.bf16.msra.mxu0 %v1456_v4  ;;  %v1251_v27 = vor.u32 %v1437_v24, %v1248_v25  ;;  %v1439_v30 = vld [vmem:[%s1944_s23 + $0x24] sm:$0xf]  ;;  %v1256_v31 = vld [vmem:[%s1944_s23 + $0x28] sm:$0xf0]  ;;  %v1255_v32 = vor.u32 %v1440_v29, %v1254_v28  ;;  %v1262_v34 = vld [vmem:[%s1944_s23 + $0x30] sm:$0xf]  ;;  %p1711_p8 = pneg %p1710_p4 }
  0x46   : > { %681 = vmatpush.bf16.msra.mxu1 %v1464_v5  ;;  %v1259_v33 = vor.u32 %v1439_v30, %v1256_v31  ;;  %v1442_v35 = vld [vmem:[%s1944_s23 + $0x34] sm:$0xf0]  ;;  %v1441_v36 = vld [vmem:[%s1944_s23 + $0x34] sm:$0xf]  ;;  %v1264_v37 = vld [vmem:[%s1944_s23 + $0x38] sm:$0xf0] }
  0x47   : > { %v1263_v38 = vor.u32 %v1442_v35, %v1262_v34  ;;  %v1267_v39 = vor.u32 %v1441_v36, %v1264_v37  ;;  %v1270_v40 = vld [vmem:[%s1944_s23 + $0x40] sm:$0xf]  ;;  %v1444_v41 = vld [vmem:[%s1944_s23 + $0x44] sm:$0xf0]  ;;  %v1443_v42 = vld [vmem:[%s1944_s23 + $0x44] sm:$0xf]  ;;  %p1716_p10 = pnand %p1715_p2, %p1711_p8 }
  0x48   : > { %v1272_v43 = vld [vmem:[%s1944_s23 + $0x48] sm:$0xf0]  ;;  %v1271_v44 = vor.u32 %v1444_v41, %v1270_v40  ;;  %v1278_v46 = vld [vmem:[%s1944_s23 + $0x50] sm:$0xf]  ;;  %v1446_v47 = vld [vmem:[%s1944_s23 + $0x54] sm:$0xf0] }
  0x49   : > { %633 = vmatpush.bf16.msra.mxu0 %v1455_v6  ;;  %v1275_v45 = vor.u32 %v1443_v42, %v1272_v43  ;;  %v1445_v48 = vld [vmem:[%s1944_s23 + $0x54] sm:$0xf]  ;;  %v1280_v49 = vld [vmem:[%s1944_s23 + $0x58] sm:$0xf0]  ;;  %v1279_v50 = vor.u32 %v1446_v47, %v1278_v46  ;;  %v1472_v54 = vld [vmem:[#allocation7 + $0x28] sm:$0xff] }
  0x4a   : > { %682 = vmatpush.bf16.msra.mxu1 %v1463_v7  ;;  %v1283_v51 = vor.u32 %v1445_v48, %v1280_v49  ;;  %v1474_v52 = vld [vmem:[#allocation7 + $0x38] sm:$0xff]  ;;  %v1473_v53 = vld [vmem:[#allocation7 + $0x30] sm:$0xff]  ;;  %v1286_v55 = vld [vmem:[%s1944_s23 + $0x60] sm:$0xf] }
  0x4b   : > { %856 = vmatpush.bf16.msra.mxu2 %v1474_v52  ;;  %v1448_v56 = vld [vmem:[%s1944_s23 + $0x64] sm:$0xf0]  ;;  %v1447_v57 = vld [vmem:[%s1944_s23 + $0x64] sm:$0xf]  ;;  %v1288_v58 = vld [vmem:[%s1944_s23 + $0x68] sm:$0xf0] }
  0x4c   : > { %v1471_v59 = vld [vmem:[#allocation7 + $0x20] sm:$0xff]  ;;  %v1287_v60 = vor.u32 %v1448_v56, %v1286_v55  ;;  %v1291_v61 = vor.u32 %v1447_v57, %v1288_v58  ;;  %v1470_v62 = vld [vmem:[#allocation7 + $0x18] sm:$0xff]  ;;  %v1469_v63 = vld [vmem:[#allocation7 + $0x10] sm:$0xff] }
  0x4d   : > { %634 = vmatpush.bf16.msra.mxu0 %v1454_v8  ;;  %v1468_v0 = vld [vmem:[#allocation7 + $0x8] sm:$0xff]  ;;  %v1294_v1 = vld [vmem:[%s1944_s23 + $0x70] sm:$0xf]  ;;  %v1450_v2 = vld [vmem:[%s1944_s23 + $0x74] sm:$0xf0] }
  0x4e   : > { %683 = vmatpush.bf16.msra.mxu1 %v1462_v9  ;;  %v1449_v3 = vld [vmem:[%s1944_s23 + $0x74] sm:$0xf]  ;;  %v1296_v4 = vld [vmem:[%s1944_s23 + $0x78] sm:$0xf0]  ;;  %v1467_v5 = vld [vmem:[#allocation7] sm:$0xff]  ;;  %v1295_v6 = vor.u32 %v1450_v2, %v1294_v1 }
  0x4f   : > { %857 = vmatpush.bf16.msra.mxu2 %v1473_v53  ;;  %v1299_v7 = vor.u32 %v1449_v3, %v1296_v4 }
  0x51   : > { %635 = vmatpush.bf16.msra.mxu0 %v1453_v10 }
  0x52   : > { %684 = vmatpush.bf16.msra.mxu1 %v1461_v11  ;;  %v1993_v11 = vld [vmem:[%s2133_s2] ss:$0 sm:$0xff] }
  0x53   : > { %858 = vmatpush.bf16.msra.mxu2 %v1472_v54 }
  0x55   : > { %636 = vmatpush.bf16.msra.mxu0 %v1452_v12 }
  0x56   : > { %685 = vmatpush.bf16.msra.mxu1 %v1460_v13  ;;  %v1999_v13 = vld [vmem:[%s2134_s3] ss:$0 sm:$0xff] }
  0x57   : > { %859 = vmatpush.bf16.msra.mxu2 %v1471_v59 }
  0x59   : > { %637 = vmatpush.bf16.msra.mxu0 %v1451_v14 }
  0x5a   : > { %686 = vmatpush.bf16.msra.mxu1 %v1459_v15 }
  0x5b   : > { %860 = vmatpush.bf16.msra.mxu2 %v1470_v62 }
  0x5c   : > { %638 = vmatmul.bf16.vlgmr.msra.gmra.mxu0 %v1239_v20 }
  0x5d   : > { %687 = vmatmul.bf16.vlgmr.msra.gmra.mxu1 %v1243_v21 }
  0x5f   : > { %861 = vmatpush.bf16.msra.mxu2 %v1469_v63 }
  0x63   : > { %862 = vmatpush.bf16.msra.mxu2 %v1468_v0 }
  0x67   : > { %863 = vmatpush.bf16.msra.mxu2 %v1467_v5 }
  0x6c   : > { %643 = vmatmul.bf16.gmra.mxu0 %v1247_v26 }
  0x6d   : > { %692 = vmatmul.bf16.gmra.mxu1 %v1251_v27 }
  0x7c   : > { %648 = vmatmul.bf16.gmra.mxu0 %v1255_v32 }
  0x7d   : > { %697 = vmatmul.bf16.gmra.mxu1 %v1259_v33 }
  0x8c   : > { %653 = vmatmul.bf16.gmra.mxu0 %v1263_v38 }
  0x8d   : > { %702 = vmatmul.bf16.gmra.mxu1 %v1267_v39 }
  0x9c   : > { %658 = vmatmul.bf16.gmra.mxu0 %v1271_v44 }
  0x9d   : > { %707 = vmatmul.bf16.gmra.mxu1 %v1275_v45 }
  0xac   : > { %663 = vmatmul.bf16.gmra.mxu0 %v1279_v50 }
  0xad   : > { %712 = vmatmul.bf16.gmra.mxu1 %v1283_v51 }
  0xbc   : > { %668 = vmatmul.bf16.gmra.mxu0 %v1287_v60 }
  0xbd   : > { %717 = vmatmul.bf16.gmra.mxu1 %v1291_v61 }
  0xcc   : > { %673 = vmatmul.bf16.gmra.mxu0 %v1295_v6 }
  0xcd   : > { %722 = vmatmul.bf16.gmra.mxu1 %v1299_v7 }
  0xd9   : > { %v639_v8 = vpop.f32.mrf.mxu0 }
  0xda   : > { %v688_v9 = vpop.f32.mrf.mxu1 }
  0xdb   : > { %v689_v10 = vadd.f32 %v688_v9, %v639_v8 }
  0xdd   : > { %v732_v12 = vmul.f32 %v1993_v11, %v689_v10 }
  0xdf   : > { %v752_v18 = vadd.f32 %v1999_v13, %v732_v12 }
  0xe1   : > { %v641_v14 = vpop.f32.mrf.mxu0  ;;  %v768_v20 = vmax.f32 %v752_v18, 0.0 }
  0xe2   : > { %v690_v15 = vpop.f32.mrf.mxu1 }
  0xe3   : > { %v691_v16 = vadd.f32 %v690_v15, %v641_v14 }
  0xe5   : > { %v733_v17 = vmul.f32 %v1993_v11, %v691_v16 }
  0xe7   : > { %v753_v19 = vadd.f32 %v1999_v13, %v733_v17 }
  0xe9   : > { %v769_v21 = vmax.f32 %v753_v19, 0.0  ;;  %v644_v22 = vpop.f32.mrf.mxu0 }
  0xea   : > { %v693_v23 = vpop.f32.mrf.mxu1 }
  0xeb   : > { %v784_v24 = vpack.c.bf16 %v769_v21, %v768_v20  ;;  %v694_v25 = vadd.f32 %v693_v23, %v644_v22 }
  0xed   : > { %864 = vmatmul.bf16.vlgmr.msra.gmra.mxu2 %v784_v24  ;;  %v734_v26 = vmul.f32 %v1993_v11, %v694_v25 }
  0xef   : > { %v754_v31 = vadd.f32 %v1999_v13, %v734_v26 }
  0xf1   : > { %v646_v27 = vpop.f32.mrf.mxu0  ;;  %v770_v33 = vmax.f32 %v754_v31, 0.0 }
  0xf2   : > { %v695_v28 = vpop.f32.mrf.mxu1 }
  0xf3   : > { %v696_v29 = vadd.f32 %v695_v28, %v646_v27 }
  0xf5   : > { %v735_v30 = vmul.f32 %v1993_v11, %v696_v29  ;;  %v1482_v29 = vld [vmem:[#allocation8 + $0x38] sm:$0xff] }
  0xf6   : > { %1037 = vmatpush.bf16.msra.mxu3 %v1482_v29 }
  0xf7   : > { %v755_v32 = vadd.f32 %v1999_v13, %v735_v30  ;;  %v1481_v30 = vld [vmem:[#allocation8 + $0x30] sm:$0xff] }
  0xf9   : > { %v771_v34 = vmax.f32 %v755_v32, 0.0  ;;  %v649_v35 = vpop.f32.mrf.mxu0 }
  0xfa   : > { %v698_v36 = vpop.f32.mrf.mxu1  ;;  %1038 = vmatpush.bf16.msra.mxu3 %v1481_v30 }
  0xfb   : > { %v785_v37 = vpack.c.bf16 %v771_v34, %v770_v33  ;;  %v699_v38 = vadd.f32 %v698_v36, %v649_v35  ;;  %v1480_v35 = vld [vmem:[#allocation8 + $0x28] sm:$0xff] }
  0xfd   : > { %869 = vmatmul.bf16.gmra.mxu2 %v785_v37  ;;  %v736_v39 = vmul.f32 %v1993_v11, %v699_v38 }
  0xfe   : > { %1039 = vmatpush.bf16.msra.mxu3 %v1480_v35 }
  0xff   : > { %v756_v44 = vadd.f32 %v1999_v13, %v736_v39  ;;  %v1479_v39 = vld [vmem:[#allocation8 + $0x20] sm:$0xff] }
 0x101   : > { %v651_v40 = vpop.f32.mrf.mxu0  ;;  %v772_v46 = vmax.f32 %v756_v44, 0.0 }
 0x102   : > { %v700_v41 = vpop.f32.mrf.mxu1  ;;  %1040 = vmatpush.bf16.msra.mxu3 %v1479_v39 }
 0x103   : > { %v701_v42 = vadd.f32 %v700_v41, %v651_v40 }
 0x105   : > { %v737_v43 = vmul.f32 %v1993_v11, %v701_v42 }
 0x107   : > { %v757_v45 = vadd.f32 %v1999_v13, %v737_v43 }
 0x109   : > { %v773_v47 = vmax.f32 %v757_v45, 0.0  ;;  %v654_v48 = vpop.f32.mrf.mxu0 }
 0x10a   : > { %v703_v49 = vpop.f32.mrf.mxu1 }
 0x10b   : > { %v786_v50 = vpack.c.bf16 %v773_v47, %v772_v46  ;;  %v704_v51 = vadd.f32 %v703_v49, %v654_v48  ;;  %v1478_v46 = vld [vmem:[#allocation8 + $0x18] sm:$0xff] }
 0x10c   : > { %1041 = vmatpush.bf16.msra.mxu3 %v1478_v46 }
 0x10d   : > { %874 = vmatmul.bf16.gmra.mxu2 %v786_v50  ;;  %v738_v52 = vmul.f32 %v1993_v11, %v704_v51  ;;  %v1477_v51 = vld [vmem:[#allocation8 + $0x10] sm:$0xff] }
 0x10f   : > { %v758_v57 = vadd.f32 %v1999_v13, %v738_v52 }
 0x110   : > { %1042 = vmatpush.bf16.msra.mxu3 %v1477_v51 }
 0x111   : > { %v656_v53 = vpop.f32.mrf.mxu0  ;;  %v774_v59 = vmax.f32 %v758_v57, 0.0 }
 0x112   : > { %v705_v54 = vpop.f32.mrf.mxu1 }
 0x113   : > { %v706_v55 = vadd.f32 %v705_v54, %v656_v53 }
 0x115   : > { %v739_v56 = vmul.f32 %v1993_v11, %v706_v55  ;;  %v1476_v55 = vld [vmem:[#allocation8 + $0x8] sm:$0xff] }
 0x116   : > { %1043 = vmatpush.bf16.msra.mxu3 %v1476_v55 }
 0x117   : > { %v759_v58 = vadd.f32 %v1999_v13, %v739_v56 }
 0x119   : > { %v775_v60 = vmax.f32 %v759_v58, 0.0  ;;  %v659_v61 = vpop.f32.mrf.mxu0 }
 0x11a   : > { %v708_v62 = vpop.f32.mrf.mxu1 }
 0x11b   : > { %v787_v63 = vpack.c.bf16 %v775_v60, %v774_v59  ;;  %v709_v0 = vadd.f32 %v708_v62, %v659_v61  ;;  %v1475_v59 = vld [vmem:[#allocation8] sm:$0xff] }
 0x11c   : > { %1044 = vmatpush.bf16.msra.mxu3 %v1475_v59  ;;  %v2035_v61 = vld [vmem:[%s2136_s5] ss:$0 sm:$0xff] }
 0x11d   : > { %879 = vmatmul.bf16.gmra.mxu2 %v787_v63  ;;  %v740_v1 = vmul.f32 %v1993_v11, %v709_v0 }
 0x11f   : > { %v760_v6 = vadd.f32 %v1999_v13, %v740_v1 }
 0x121   : > { %v661_v2 = vpop.f32.mrf.mxu0  ;;  %v776_v8 = vmax.f32 %v760_v6, 0.0 }
 0x122   : > { %v710_v3 = vpop.f32.mrf.mxu1 }
 0x123   : > { %v711_v4 = vadd.f32 %v710_v3, %v661_v2 }
 0x125   : > { %v741_v5 = vmul.f32 %v1993_v11, %v711_v4 }
 0x127   : > { %v761_v7 = vadd.f32 %v1999_v13, %v741_v5 }
 0x129   : > { %v777_v9 = vmax.f32 %v761_v7, 0.0  ;;  %v664_v10 = vpop.f32.mrf.mxu0 }
 0x12a   : > { %v713_v12 = vpop.f32.mrf.mxu1 }
 0x12b   : > { %v788_v14 = vpack.c.bf16 %v777_v9, %v776_v8  ;;  %v714_v15 = vadd.f32 %v713_v12, %v664_v10 }
 0x12d   : > { %884 = vmatmul.bf16.gmra.mxu2 %v788_v14  ;;  %v742_v16 = vmul.f32 %v1993_v11, %v714_v15 }
 0x12f   : > { %v762_v21 = vadd.f32 %v1999_v13, %v742_v16 }
 0x131   : > { %v666_v17 = vpop.f32.mrf.mxu0  ;;  %v778_v23 = vmax.f32 %v762_v21, 0.0 }
 0x132   : > { %v715_v18 = vpop.f32.mrf.mxu1 }
 0x133   : > { %v716_v19 = vadd.f32 %v715_v18, %v666_v17 }
 0x135   : > { %v743_v20 = vmul.f32 %v1993_v11, %v716_v19 }
 0x137   : > { %v763_v22 = vadd.f32 %v1999_v13, %v743_v20 }
 0x139   : > { %v779_v24 = vmax.f32 %v763_v22, 0.0  ;;  %v669_v25 = vpop.f32.mrf.mxu0 }
 0x13a   : > { %v718_v26 = vpop.f32.mrf.mxu1 }
 0x13b   : > { %v789_v27 = vpack.c.bf16 %v779_v24, %v778_v23  ;;  %v719_v28 = vadd.f32 %v718_v26, %v669_v25 }
 0x13d   : > { %889 = vmatmul.bf16.gmra.mxu2 %v789_v27  ;;  %v744_v31 = vmul.f32 %v1993_v11, %v719_v28 }
 0x13f   : > { %v764_v37 = vadd.f32 %v1999_v13, %v744_v31 }
 0x141   : > { %v671_v32 = vpop.f32.mrf.mxu0  ;;  %v780_v40 = vmax.f32 %v764_v37, 0.0 }
 0x142   : > { %v720_v33 = vpop.f32.mrf.mxu1 }
 0x143   : > { %v721_v34 = vadd.f32 %v720_v33, %v671_v32 }
 0x145   : > { %v745_v36 = vmul.f32 %v1993_v11, %v721_v34 }
 0x147   : > { %v765_v38 = vadd.f32 %v1999_v13, %v745_v36 }
 0x149   : > { %v781_v41 = vmax.f32 %v765_v38, 0.0  ;;  %v674_v42 = vpop.f32.mrf.mxu0 }
 0x14a   : > { %v723_v43 = vpop.f32.mrf.mxu1 }
 0x14b   : > { %v790_v44 = vpack.c.bf16 %v781_v41, %v780_v40  ;;  %v724_v45 = vadd.f32 %v723_v43, %v674_v42 }
 0x14d   : > { %894 = vmatmul.bf16.gmra.mxu2 %v790_v44  ;;  %v746_v47 = vmul.f32 %v1993_v11, %v724_v45 }
 0x14f   : > { %v766_v53 = vadd.f32 %v1999_v13, %v746_v47 }
 0x151   : > { %v676_v48 = vpop.f32.mrf.mxu0  ;;  %v782_v56 = vmax.f32 %v766_v53, 0.0 }
 0x152   : > { %v725_v49 = vpop.f32.mrf.mxu1 }
 0x153   : > { %v726_v50 = vadd.f32 %v725_v49, %v676_v48 }
 0x155   : > { %v747_v52 = vmul.f32 %v1993_v11, %v726_v50 }
 0x157   : > { %v767_v54 = vadd.f32 %v1999_v13, %v747_v52  ;;  %v2041_v13 = vld [vmem:[%s2137_s6] ss:$0 sm:$0xff] }
 0x159   : > { %v783_v57 = vmax.f32 %v767_v54, 0.0 }
 0x15b   : > { %v791_v58 = vpack.c.bf16 %v783_v57, %v782_v56 }
 0x15d   : > { %899 = vmatmul.bf16.gmra.mxu2 %v791_v58 }
 0x170   : > { %v865_v60 = vpop.f32.mrf.mxu2 }
 0x171   : > { %v909_v11 = vmul.f32 %v2035_v61, %v865_v60 }
 0x173   : > { %v929_v63 = vadd.f32 %v2041_v13, %v909_v11 }
 0x175   : > { %v945_v2 = vmax.f32 %v929_v63, 0.0 }
 0x178   : > { %v867_v62 = vpop.f32.mrf.mxu2 }
 0x179   : > { %v910_v0 = vmul.f32 %v2035_v61, %v867_v62 }
 0x17b   : > { %v930_v1 = vadd.f32 %v2041_v13, %v910_v0 }
 0x17d   : > { %v946_v3 = vmax.f32 %v930_v1, 0.0 }
 0x17f   : > { %v961_v4 = vpack.c.bf16 %v946_v3, %v945_v2 }
 0x180   : > { %v870_v5 = vpop.f32.mrf.mxu2 }
 0x181   : > { %1045 = vmatmul.bf16.vlgmr.msra.gmra.mxu3 %v961_v4  ;;  %v911_v6 = vmul.f32 %v2035_v61, %v870_v5 }
 0x183   : > { %v931_v8 = vadd.f32 %v2041_v13, %v911_v6  ;;  %v1571_v6 = vld [vmem:[%s2139_s8] ss:$0 sm:$0xff] }
 0x185   : > { %v947_v12 = vmax.f32 %v931_v8, 0.0 }
 0x188   : > { %v872_v7 = vpop.f32.mrf.mxu2 }
 0x189   : > { %v912_v9 = vmul.f32 %v2035_v61, %v872_v7 }
 0x18b   : > { %v932_v10 = vadd.f32 %v2041_v13, %v912_v9 }
 0x18d   : > { %v948_v14 = vmax.f32 %v932_v10, 0.0 }
 0x18f   : > { %v962_v15 = vpack.c.bf16 %v948_v14, %v947_v12 }
 0x190   : > { %v875_v16 = vpop.f32.mrf.mxu2 }
 0x191   : > { %1050 = vmatmul.bf16.gmra.mxu3 %v962_v15  ;;  %v913_v17 = vmul.f32 %v2035_v61, %v875_v16 }
 0x193   : > { %v933_v19 = vadd.f32 %v2041_v13, %v913_v17 }
 0x195   : > { %v949_v22 = vmax.f32 %v933_v19, 0.0 }
 0x198   : > { %v877_v18 = vpop.f32.mrf.mxu2 }
 0x199   : > { %v914_v20 = vmul.f32 %v2035_v61, %v877_v18 }
 0x19b   : > { %v934_v21 = vadd.f32 %v2041_v13, %v914_v20 }
 0x19d   : > { %v950_v23 = vmax.f32 %v934_v21, 0.0 }
 0x19f   : > { %v963_v24 = vpack.c.bf16 %v950_v23, %v949_v22 }
 0x1a0   : > { %v880_v25 = vpop.f32.mrf.mxu2 }
 0x1a1   : > { %1055 = vmatmul.bf16.gmra.mxu3 %v963_v24  ;;  %v915_v26 = vmul.f32 %v2035_v61, %v880_v25 }
 0x1a3   : > { %v935_v28 = vadd.f32 %v2041_v13, %v915_v26 }
 0x1a5   : > { %v951_v31 = vmax.f32 %v935_v28, 0.0 }
 0x1a8   : > { %v882_v27 = vpop.f32.mrf.mxu2 }
 0x1a9   : > { %v916_v29 = vmul.f32 %v2035_v61, %v882_v27 }
 0x1ab   : > { %v936_v30 = vadd.f32 %v2041_v13, %v916_v29 }
 0x1ad   : > { %v952_v32 = vmax.f32 %v936_v30, 0.0 }
 0x1af   : > { %v964_v33 = vpack.c.bf16 %v952_v32, %v951_v31 }
 0x1b0   : > { %v885_v34 = vpop.f32.mrf.mxu2 }
 0x1b1   : > { %1060 = vmatmul.bf16.gmra.mxu3 %v964_v33  ;;  %v917_v35 = vmul.f32 %v2035_v61, %v885_v34 }
 0x1b3   : > { %v937_v37 = vadd.f32 %v2041_v13, %v917_v35 }
 0x1b5   : > { %v953_v40 = vmax.f32 %v937_v37, 0.0 }
 0x1b8   : > { %v887_v36 = vpop.f32.mrf.mxu2 }
 0x1b9   : > { %v918_v38 = vmul.f32 %v2035_v61, %v887_v36 }
 0x1bb   : > { %v938_v39 = vadd.f32 %v2041_v13, %v918_v38 }
 0x1bd   : > { %v954_v41 = vmax.f32 %v938_v39, 0.0 }
 0x1bf   : > { %v965_v42 = vpack.c.bf16 %v954_v41, %v953_v40 }
 0x1c0   : > { %v890_v43 = vpop.f32.mrf.mxu2 }
 0x1c1   : > { %1065 = vmatmul.bf16.gmra.mxu3 %v965_v42  ;;  %v919_v44 = vmul.f32 %v2035_v61, %v890_v43 }
 0x1c3   : > { %v939_v46 = vadd.f32 %v2041_v13, %v919_v44 }
 0x1c5   : > { %v955_v49 = vmax.f32 %v939_v46, 0.0 }
 0x1c8   : > { %v892_v45 = vpop.f32.mrf.mxu2 }
 0x1c9   : > { %v920_v47 = vmul.f32 %v2035_v61, %v892_v45 }
 0x1cb   : > { %v940_v48 = vadd.f32 %v2041_v13, %v920_v47 }
 0x1cd   : > { %v956_v50 = vmax.f32 %v940_v48, 0.0 }
 0x1cf   : > { %v966_v51 = vpack.c.bf16 %v956_v50, %v955_v49 }
 0x1d0   : > { %v895_v52 = vpop.f32.mrf.mxu2 }
 0x1d1   : > { %1070 = vmatmul.bf16.gmra.mxu3 %v966_v51  ;;  %v921_v53 = vmul.f32 %v2035_v61, %v895_v52 }
 0x1d3   : > { %v941_v55 = vadd.f32 %v2041_v13, %v921_v53 }
 0x1d5   : > { %v957_v58 = vmax.f32 %v941_v55, 0.0 }
 0x1d8   : > { %v897_v54 = vpop.f32.mrf.mxu2 }
 0x1d9   : > { %v922_v56 = vmul.f32 %v2035_v61, %v897_v54 }
 0x1db   : > { %v942_v57 = vadd.f32 %v2041_v13, %v922_v56 }
 0x1dd   : > { %v958_v59 = vmax.f32 %v942_v57, 0.0 }
 0x1df   : > { %v967_v60 = vpack.c.bf16 %v958_v59, %v957_v58 }
 0x1e0   : > { %v900_v11 = vpop.f32.mrf.mxu2 }
 0x1e1   : > { %1075 = vmatmul.bf16.gmra.mxu3 %v967_v60  ;;  %v923_v62 = vmul.f32 %v2035_v61, %v900_v11 }
 0x1e3   : > { %v943_v0 = vadd.f32 %v2041_v13, %v923_v62 }
 0x1e5   : > { %v959_v3 = vmax.f32 %v943_v0, 0.0 }
 0x1e8   : > { %v902_v63 = vpop.f32.mrf.mxu2 }
 0x1e9   : > { %v924_v1 = vmul.f32 %v2035_v61, %v902_v63 }
 0x1eb   : > { %v944_v2 = vadd.f32 %v2041_v13, %v924_v1 }
 0x1ed   : > { %v960_v4 = vmax.f32 %v944_v2, 0.0 }
 0x1ef   : > { %v968_v5 = vpack.c.bf16 %v960_v4, %v959_v3 }
 0x1f1   : > { %1080 = vmatmul.bf16.gmra.mxu3 %v968_v5 }
 0x204   : > { %v1046_v7 = vpop.f32.mrf.mxu3 }
 0x205   : > { %v1047_v8 = vadd.f32 %v1571_v6, %v1046_v7 }
 0x207   : > { %1086 = vst [vmem:[%s2079_s25] sm:$0xff] %v1047_v8 }
 0x20c   : > { %v1048_v61 = vpop.f32.mrf.mxu3 }
 0x20d   : > { %v1049_v13 = vadd.f32 %v1571_v6, %v1048_v61 }
 0x20f   : > { %1087 = vst [vmem:[%s2079_s25 + $0x8] sm:$0xff] %v1049_v13 }
 0x214   : > { %v1051_v9 = vpop.f32.mrf.mxu3 }
 0x215   : > { %v1052_v10 = vadd.f32 %v1571_v6, %v1051_v9 }
 0x217   : > { %1088 = vst [vmem:[%s2079_s25 + $0x10] sm:$0xff] %v1052_v10 }
 0x21c   : > { %v1053_v12 = vpop.f32.mrf.mxu3 }
 0x21d   : > { %v1054_v14 = vadd.f32 %v1571_v6, %v1053_v12 }
 0x21f   : > { %1089 = vst [vmem:[%s2079_s25 + $0x18] sm:$0xff] %v1054_v14 }
 0x224   : > { %v1056_v15 = vpop.f32.mrf.mxu3 }
 0x225   : > { %v1057_v16 = vadd.f32 %v1571_v6, %v1056_v15 }
 0x227   : > { %1090 = vst [vmem:[%s2079_s25 + $0x20] sm:$0xff] %v1057_v16 }
 0x22c   : > { %v1058_v17 = vpop.f32.mrf.mxu3 }
 0x22d   : > { %v1059_v18 = vadd.f32 %v1571_v6, %v1058_v17 }
 0x22f   : > { %1091 = vst [vmem:[%s2079_s25 + $0x28] sm:$0xff] %v1059_v18 }
 0x234   : > { %v1061_v19 = vpop.f32.mrf.mxu3 }
 0x235   : > { %v1062_v20 = vadd.f32 %v1571_v6, %v1061_v19 }
 0x237   : > { %1092 = vst [vmem:[%s2079_s25 + $0x30] sm:$0xff] %v1062_v20 }
 0x23c   : > { %v1063_v21 = vpop.f32.mrf.mxu3 }
 0x23d   : > { %v1064_v22 = vadd.f32 %v1571_v6, %v1063_v21 }
 0x23f   : > { %1093 = vst [vmem:[%s2079_s25 + $0x38] sm:$0xff] %v1064_v22 }
 0x244   : > { %v1066_v23 = vpop.f32.mrf.mxu3 }
 0x245   : > { %v1067_v24 = vadd.f32 %v1571_v6, %v1066_v23 }
 0x247   : > { %1094 = vst [vmem:[%s2079_s25 + $0x40] sm:$0xff] %v1067_v24 }
 0x24c   : > { %v1068_v25 = vpop.f32.mrf.mxu3 }
 0x24d   : > { %v1069_v26 = vadd.f32 %v1571_v6, %v1068_v25 }
 0x24f   : > { %1095 = vst [vmem:[%s2079_s25 + $0x48] sm:$0xff] %v1069_v26 }
 0x254   : > { %v1071_v27 = vpop.f32.mrf.mxu3 }
 0x255   : > { %v1072_v28 = vadd.f32 %v1571_v6, %v1071_v27 }
 0x257   : > { %1096 = vst [vmem:[%s2079_s25 + $0x50] sm:$0xff] %v1072_v28 }
 0x25c   : > { %v1073_v29 = vpop.f32.mrf.mxu3 }
 0x25d   : > { %v1074_v30 = vadd.f32 %v1571_v6, %v1073_v29 }
 0x25f   : > { %1097 = vst [vmem:[%s2079_s25 + $0x58] sm:$0xff] %v1074_v30 }
 0x264   : > { %v1076_v31 = vpop.f32.mrf.mxu3 }
 0x265   : > { %v1077_v32 = vadd.f32 %v1571_v6, %v1076_v31 }
 0x267   : > { %1098 = vst [vmem:[%s2079_s25 + $0x60] sm:$0xff] %v1077_v32 }
 0x26c   : > { %v1078_v33 = vpop.f32.mrf.mxu3 }
 0x26d   : > { %v1079_v34 = vadd.f32 %v1571_v6, %v1078_v33 }
 0x26f   : > { %1099 = vst [vmem:[%s2079_s25 + $0x68] sm:$0xff] %v1079_v34 }
 0x274   : > { %v1081_v35 = vpop.f32.mrf.mxu3 }
 0x275   : > { %v1082_v36 = vadd.f32 %v1571_v6, %v1081_v35 }
 0x277   : > { %1100 = vst [vmem:[%s2079_s25 + $0x70] sm:$0xff] %v1082_v36 }
 0x27c   : > { %v1083_v37 = vpop.f32.mrf.mxu3 }
 0x27d   : > { %v1084_v38 = vadd.f32 %v1571_v6, %v1083_v37 }
 0x27f   : > { %1101 = vst [vmem:[%s2079_s25 + $0x78] sm:$0xff] %v1084_v38 }
 0x280   : > { %1719 = shalt.err (!%p1716_p10)
}
 0x281   : > { %s1775_s18 = smov 128   ;;  %s1776_s25 = smov 8  }
 0x282   : > { %1498 = dma.vmem_to_hbm [thread:$0]  (%p1910_p7), %s1116_s15, 2048, %s1118_s20, %s1103_s21, %s1775_s18, %s1775_s18, %s1776_s25  }
 0x283 PF: > { %s1132_s4 = sand.u32 1, %s1754_s30   ;;  %p2153_p12 = scmp.ge.s32.totalorder %s1766_s12, 2 }
 0x284   : > { %s1133_s7 = scalar_lea.sflag [#allocation4], %s1132_s4 }
 0x285   : > { %p1515_p13 = pnand %p2153_p12, %p1862_p6 }
 0x287   : > { %p1516_p0 = pneg %p1515_p13 }
 0x289   : > { %1749 = dma.done.wait (%p1516_p0), %s1133_s7, 2048  }
 0x28a   : > { %1751 = vsyncadd (%p1516_p0), %s1133_s7, 4294965248  ;;  %p24_p3 = scmp.ge.s32.totalorder %s1894_s19, 4   ;;  %s2154_s30 = smov %s1758_s10 }
 0x28b   : > { %s2155_s10 = smov %s1762_s11  ;;  %s2156_s11 = smov %s1906_s17 }
 0x28c   : > { %s2157_s12 = smov %s1894_s19  ;;  %26 = sbr.rel (!%p24_p3) target bundleno = 11 (0xb), region = 113 }
 0x291   :  { %1139 = vsyncpa [#allocation3], 1 }
 0x292   :  { %1141 = vsyncpa [#allocation3 + $0x1], 1 }
 0x293   :  { %1142 = vsyncpa [#allocation6], 1 }
 0x294   :  { %1143 = vsyncpa [#allocation9], 1 }
 0x295   :  { %1144 = vsyncpa [#allocation4], 1 }
 0x296   :  { %1146 = vsyncpa [#allocation4 + $0x1], 1 }

</bundles_post_ra>
